<compile_context>
chip_gen: v6e
topology: v6e:2x2x1
jax: 0.10.0
libtpu: 0.0.40
codegen_flags: <defaults>
</compile_context>

<pallas_src>
import math
import functools

import jax
import jax.numpy as jnp
from jax.experimental import pallas as pl
from jax.experimental.pallas import tpu as pltpu


def _sinusoidal_kernel(x_ref, o_ref, *, num_deg, base_scale, use_identity):
    # x_ref: (TILE_M, 128) dense flat slab of inputs.
    # o_ref: (R, TILE_M, 128); row r is one feature block over the same slab.
    x = x_ref[...]
    t = x.astype(jnp.float32)            # compute in f32 even for bf16 inputs

    off = 0
    if use_identity:
        o_ref[0, :, :] = x               # identity block, bit-exact copy
        off = 1

    a = t if base_scale == 1.0 else t * jnp.float32(base_scale)
    s = jnp.sin(a)                       # the only transcendentals in the kernel
    c = jnp.cos(a)
    for d in range(num_deg):
        o_ref[off + d, :, :] = s.astype(o_ref.dtype)
        o_ref[off + num_deg + d, :, :] = c.astype(o_ref.dtype)
        if d + 1 < num_deg:
            # Double-angle recurrence: sin(2a) = 2 s c, cos(2a) = 1 - 2 s^2.
            s, c = 2.0 * s * c, 1.0 - 2.0 * (s * s)


def _round_up(v, m):
    return ((v + m - 1) // m) * m


def _num_tensorcores():
    # v7x shards the "parallel" grid axis across 2 TensorCores; v5e/v6e have 1.
    # Heuristic only (used for grid balancing) — safe fallback to 1.
    try:
        kind = jax.devices()[0].device_kind.lower()
        return 2 if "7" in kind else 1
    except Exception:
        return 1


def _choose_grid(m_rows, r_rows, itemsize):
    """Pick (tile_m, num_steps) for the 1-D grid over the [M, 128] slab."""
    # Bytes per slab row (128 lanes): one input row + R output rows.
    bytes_per_row = (1 + r_rows) * 128 * itemsize
    # Keep double-buffered in+out blocks well under the smallest scoped-VMEM
    # default (v5e: 16 MiB); temporaries/pipeline get the rest of the 32 MiB cap.
    vmem_budget = 12 * 1024 * 1024
    max_tile = min(1024, max(8, (vmem_budget // (2 * bytes_per_row)) // 8 * 8))

    num_tc = _num_tensorcores()
    min_steps = num_tc if m_rows >= 16 * num_tc else 1
    steps = max(min_steps, pl.cdiv(m_rows, max_tile))
    if num_tc > 1:
        steps = _round_up(steps, num_tc)          # balanced across TensorCores
    tile = pl.cdiv(m_rows, steps)
    if tile < m_rows:
        tile = _round_up(tile, 8)                 # sublane-aligned unless full dim
    return tile, pl.cdiv(m_rows, tile)


def sinusoidal_encode(x, x_dim, min_deg, max_deg, use_identity=False,
                      channel_major_output=False):
    """Pallas implementation of SinusoidalEncoder.forward.

    x: [..., x_dim] float array.
    Returns [..., latent_dim] with
      latent_dim = (int(use_identity) + (max_deg - min_deg) * 2) * x_dim.
    If channel_major_output=True, returns the [R, N, x_dim] feature slab
    (R = use_identity + 2*num_deg) and skips the final channel-interleave
    transpose for consumers that can take it directly.
    """
    assert x.shape[-1] == x_dim
    if max_deg == min_deg:
        return x

    num_deg = max_deg - min_deg
    r_rows = int(use_identity) + 2 * num_deg
    latent_dim = r_rows * x_dim
    lead_shape = x.shape[:-1]
    n = 1
    for d in lead_shape:
        n *= int(d)
    if n == 0:
        return jnp.zeros((*lead_shape, latent_dim), x.dtype)

    # Flatten to a dense [M, 128] slab (free reshape; pad only if N*x_dim is
    # not lane-aligned).
    f = n * x_dim
    xf = x.reshape(f)
    pad = (-f) % 128
    if pad:
        xf = jnp.pad(xf, (0, pad))
    m_rows = (f + pad) // 128
    x2 = xf.reshape(m_rows, 128)

    itemsize = jnp.dtype(x.dtype).itemsize
    tile_m, steps = _choose_grid(m_rows, r_rows, itemsize)

    kernel = functools.partial(
        _sinusoidal_kernel,
        num_deg=num_deg,
        base_scale=float(2.0 ** min_deg),
        use_identity=bool(use_identity),
    )

    out3 = pl.pallas_call(
        kernel,
        out_shape=jax.ShapeDtypeStruct((r_rows, m_rows, 128), x.dtype),
        grid=(steps,),
        in_specs=[pl.BlockSpec((tile_m, 128), lambda i: (i, 0))],
        out_specs=pl.BlockSpec((r_rows, tile_m, 128), lambda i: (0, i, 0)),
        compiler_params=pltpu.CompilerParams(
            dimension_semantics=("parallel",),
            vmem_limit_bytes=32 * 1024 * 1024,
        ),
        cost_estimate=pl.CostEstimate(
            flops=(5 * max(num_deg - 1, 0) + 2) * m_rows * 128,
            transcendentals=2 * m_rows * 128,
            bytes_accessed=(1 + r_rows) * m_rows * 128 * itemsize,
        ),
    )(x2)

    # [R, M, 128] -> [R, N, x_dim] (drop lane padding; free/fused reshapes).
    blocks = out3.reshape(r_rows, m_rows * 128)[:, :f].reshape(r_rows, n, x_dim)
    if channel_major_output:
        return blocks
    # Single XLA transpose back to channel-last [..., latent_dim]; matches the
    # torch ordering [identity | sin per degree | cos per degree].
    return jnp.transpose(blocks, (1, 0, 2)).reshape(*lead_shape, latent_dim)


def sinusoidal_encode_ref(x, min_deg, max_deg, use_identity=False):
    """Pure-JAX reference mirroring the torch code exactly."""
    if max_deg == min_deg:
        return x
    scales = jnp.array([2 ** i for i in range(min_deg, max_deg)], dtype=x.dtype)
    xb = (x[..., None, :] * scales[:, None]).reshape(
        *x.shape[:-1], (max_deg - min_deg) * x.shape[-1]
    )
    latent = jnp.sin(jnp.concatenate([xb, xb + 0.5 * math.pi], axis=-1))
    if use_identity:
        latent = jnp.concatenate([x, latent], axis=-1)
    return latent


if __name__ == "__main__":
    # Module config (deterministic, defined in-script): NeRF-style encoder.
    x_dim, min_deg, max_deg, use_identity = 3, 0, 4, True

    key = jax.random.PRNGKey(0)
    # [..., x_dim] input; leading dims (2, 128) flatten to 256 points.
    x = jax.random.normal(key, (2, 128, x_dim), dtype=jnp.float32)

    out = sinusoidal_encode(x, x_dim, min_deg, max_deg, use_identity)
    out = jax.block_until_ready(out)

    ref = sinusoidal_encode_ref(x, min_deg, max_deg, use_identity)
    expected_latent_dim = (int(use_identity) + (max_deg - min_deg) * 2) * x_dim
    assert out.shape == (2, 128, expected_latent_dim), out.shape
    assert jnp.allclose(out, ref, atol=1e-5, rtol=1e-5), float(
        jnp.max(jnp.abs(out - ref))
    )
    print("KERNEL_OK")
</pallas_src>

<mosaic_0001>
module attributes {stable_mosaic.version = 11 : i64} {
  func.func @_sinusoidal_kernel(%arg0: i32, %arg1: memref<6x128xf32, #tpu.memory_space<vmem>>, %arg2: memref<9x6x128xf32, #tpu.memory_space<vmem>>) attributes {dimension_semantics = [#tpu.dimension_semantics<parallel>], iteration_bounds = array<i64: 1>, scalar_prefetch = 0 : i64, scratch_operands = 0 : i64, tpu.core_type = #tpu.core_type<tc>, window_params = [{transform_indices = @transform_0, window_bounds = array<i64: 6, 128>}, {transform_indices = @transform_1, window_bounds = array<i64: 9, 6, 128>}]} {
    %c0 = arith.constant 0 : index
    %c0_0 = arith.constant 0 : index
    %0 = vector.load %arg1[%c0, %c0_0] : memref<6x128xf32, #tpu.memory_space<vmem>>, vector<6x128xf32>
    %c0_1 = arith.constant 0 : index
    %c0_2 = arith.constant 0 : index
    %c0_3 = arith.constant 0 : index
    %1 = vector.load %arg2[%c0_1, %c0_2, %c0_3] : memref<9x6x128xf32, #tpu.memory_space<vmem>>, vector<1x6x128xf32>
    %2 = vector.shape_cast %1 : vector<1x6x128xf32> to vector<6x128xf32>
    %3 = vector.shape_cast %0 : vector<6x128xf32> to vector<1x6x128xf32>
    tpu.vector_store %arg2[%c0_1, %c0_2, %c0_3], %3 {strides = array<i32>} : memref<9x6x128xf32, #tpu.memory_space<vmem>>, vector<1x6x128xf32>,
    %4 = math.sin %0 : vector<6x128xf32>
    %5 = math.cos %0 : vector<6x128xf32>
    %c1 = arith.constant 1 : index
    %c0_4 = arith.constant 0 : index
    %c0_5 = arith.constant 0 : index
    %6 = vector.load %arg2[%c1, %c0_4, %c0_5] : memref<9x6x128xf32, #tpu.memory_space<vmem>>, vector<1x6x128xf32>
    %7 = vector.shape_cast %6 : vector<1x6x128xf32> to vector<6x128xf32>
    %8 = vector.shape_cast %4 : vector<6x128xf32> to vector<1x6x128xf32>
    tpu.vector_store %arg2[%c1, %c0_4, %c0_5], %8 {strides = array<i32>} : memref<9x6x128xf32, #tpu.memory_space<vmem>>, vector<1x6x128xf32>,
    %c5 = arith.constant 5 : index
    %c0_6 = arith.constant 0 : index
    %c0_7 = arith.constant 0 : index
    %9 = vector.load %arg2[%c5, %c0_6, %c0_7] : memref<9x6x128xf32, #tpu.memory_space<vmem>>, vector<1x6x128xf32>
    %10 = vector.shape_cast %9 : vector<1x6x128xf32> to vector<6x128xf32>
    %11 = vector.shape_cast %5 : vector<6x128xf32> to vector<1x6x128xf32>
    tpu.vector_store %arg2[%c5, %c0_6, %c0_7], %11 {strides = array<i32>} : memref<9x6x128xf32, #tpu.memory_space<vmem>>, vector<1x6x128xf32>,
    %cst = arith.constant 2.000000e+00 : f32
    %12 = vector.broadcast %cst : f32 to vector<6x128xf32>
    %13 = arith.mulf %12, %4 : vector<6x128xf32>
    %14 = arith.mulf %13, %5 : vector<6x128xf32>
    %15 = arith.mulf %4, %4 : vector<6x128xf32>
    %cst_8 = arith.constant 2.000000e+00 : f32
    %16 = vector.broadcast %cst_8 : f32 to vector<6x128xf32>
    %17 = arith.mulf %16, %15 : vector<6x128xf32>
    %cst_9 = arith.constant 1.000000e+00 : f32
    %18 = vector.broadcast %cst_9 : f32 to vector<6x128xf32>
    %19 = arith.subf %18, %17 : vector<6x128xf32>
    %c2 = arith.constant 2 : index
    %c0_10 = arith.constant 0 : index
    %c0_11 = arith.constant 0 : index
    %20 = vector.load %arg2[%c2, %c0_10, %c0_11] : memref<9x6x128xf32, #tpu.memory_space<vmem>>, vector<1x6x128xf32>
    %21 = vector.shape_cast %20 : vector<1x6x128xf32> to vector<6x128xf32>
    %22 = vector.shape_cast %14 : vector<6x128xf32> to vector<1x6x128xf32>
    tpu.vector_store %arg2[%c2, %c0_10, %c0_11], %22 {strides = array<i32>} : memref<9x6x128xf32, #tpu.memory_space<vmem>>, vector<1x6x128xf32>,
    %c6 = arith.constant 6 : index
    %c0_12 = arith.constant 0 : index
    %c0_13 = arith.constant 0 : index
    %23 = vector.load %arg2[%c6, %c0_12, %c0_13] : memref<9x6x128xf32, #tpu.memory_space<vmem>>, vector<1x6x128xf32>
    %24 = vector.shape_cast %23 : vector<1x6x128xf32> to vector<6x128xf32>
    %25 = vector.shape_cast %19 : vector<6x128xf32> to vector<1x6x128xf32>
    tpu.vector_store %arg2[%c6, %c0_12, %c0_13], %25 {strides = array<i32>} : memref<9x6x128xf32, #tpu.memory_space<vmem>>, vector<1x6x128xf32>,
    %cst_14 = arith.constant 2.000000e+00 : f32
    %26 = vector.broadcast %cst_14 : f32 to vector<6x128xf32>
    %27 = arith.mulf %26, %14 : vector<6x128xf32>
    %28 = arith.mulf %27, %19 : vector<6x128xf32>
    %29 = arith.mulf %14, %14 : vector<6x128xf32>
    %cst_15 = arith.constant 2.000000e+00 : f32
    %30 = vector.broadcast %cst_15 : f32 to vector<6x128xf32>
    %31 = arith.mulf %30, %29 : vector<6x128xf32>
    %cst_16 = arith.constant 1.000000e+00 : f32
    %32 = vector.broadcast %cst_16 : f32 to vector<6x128xf32>
    %33 = arith.subf %32, %31 : vector<6x128xf32>
    %c3 = arith.constant 3 : index
    %c0_17 = arith.constant 0 : index
    %c0_18 = arith.constant 0 : index
    %34 = vector.load %arg2[%c3, %c0_17, %c0_18] : memref<9x6x128xf32, #tpu.memory_space<vmem>>, vector<1x6x128xf32>
    %35 = vector.shape_cast %34 : vector<1x6x128xf32> to vector<6x128xf32>
    %36 = vector.shape_cast %28 : vector<6x128xf32> to vector<1x6x128xf32>
    tpu.vector_store %arg2[%c3, %c0_17, %c0_18], %36 {strides = array<i32>} : memref<9x6x128xf32, #tpu.memory_space<vmem>>, vector<1x6x128xf32>,
    %c7 = arith.constant 7 : index
    %c0_19 = arith.constant 0 : index
    %c0_20 = arith.constant 0 : index
    %37 = vector.load %arg2[%c7, %c0_19, %c0_20] : memref<9x6x128xf32, #tpu.memory_space<vmem>>, vector<1x6x128xf32>
    %38 = vector.shape_cast %37 : vector<1x6x128xf32> to vector<6x128xf32>
    %39 = vector.shape_cast %33 : vector<6x128xf32> to vector<1x6x128xf32>
    tpu.vector_store %arg2[%c7, %c0_19, %c0_20], %39 {strides = array<i32>} : memref<9x6x128xf32, #tpu.memory_space<vmem>>, vector<1x6x128xf32>,
    %cst_21 = arith.constant 2.000000e+00 : f32
    %40 = vector.broadcast %cst_21 : f32 to vector<6x128xf32>
    %41 = arith.mulf %40, %28 : vector<6x128xf32>
    %42 = arith.mulf %41, %33 : vector<6x128xf32>
    %43 = arith.mulf %28, %28 : vector<6x128xf32>
    %cst_22 = arith.constant 2.000000e+00 : f32
    %44 = vector.broadcast %cst_22 : f32 to vector<6x128xf32>
    %45 = arith.mulf %44, %43 : vector<6x128xf32>
    %cst_23 = arith.constant 1.000000e+00 : f32
    %46 = vector.broadcast %cst_23 : f32 to vector<6x128xf32>
    %47 = arith.subf %46, %45 : vector<6x128xf32>
    %c4 = arith.constant 4 : index
    %c0_24 = arith.constant 0 : index
    %c0_25 = arith.constant 0 : index
    %48 = vector.load %arg2[%c4, %c0_24, %c0_25] : memref<9x6x128xf32, #tpu.memory_space<vmem>>, vector<1x6x128xf32>
    %49 = vector.shape_cast %48 : vector<1x6x128xf32> to vector<6x128xf32>
    %50 = vector.shape_cast %42 : vector<6x128xf32> to vector<1x6x128xf32>
    tpu.vector_store %arg2[%c4, %c0_24, %c0_25], %50 {strides = array<i32>} : memref<9x6x128xf32, #tpu.memory_space<vmem>>, vector<1x6x128xf32>,
    %c8 = arith.constant 8 : index
    %c0_26 = arith.constant 0 : index
    %c0_27 = arith.constant 0 : index
    %51 = vector.load %arg2[%c8, %c0_26, %c0_27] : memref<9x6x128xf32, #tpu.memory_space<vmem>>, vector<1x6x128xf32>
    %52 = vector.shape_cast %51 : vector<1x6x128xf32> to vector<6x128xf32>
    %53 = vector.shape_cast %47 : vector<6x128xf32> to vector<1x6x128xf32>
    tpu.vector_store %arg2[%c8, %c0_26, %c0_27], %53 {strides = array<i32>} : memref<9x6x128xf32, #tpu.memory_space<vmem>>, vector<1x6x128xf32>,
    return
  }
  func.func @transform_0(%arg0: i32) -> (i32, i32) {
    %c0_i32 = arith.constant 0 : i32
    %c0_i32_0 = arith.constant 0 : i32
    return %arg0, %c0_i32 : i32, i32
  }
  func.func @transform_1(%arg0: i32) -> (i32, i32, i32) {
    %c0_i32 = arith.constant 0 : i32
    %c0_i32_0 = arith.constant 0 : i32
    %c0_i32_1 = arith.constant 0 : i32
    return %c0_i32, %arg0, %c0_i32_0 : i32, i32, i32
  }
}

</mosaic_0001>

<bundles_post_ra>
// kernel: tpu_custom_call.1
= control target key start
LH: loop header
LB: loop body
LE: loop exit
PB: predicated region body
PF: predicated region fallthrough
CT: control target
= control target key end

     0   :  { %6 = vsyncpa [#allocation3], 0  ;;  %s396_s0 = inlined_call_operand.hbm [shape: f32[6,128], index: 0, kind: input, shape index: {}]   ;;  %s397_s1 = inlined_call_operand.hbm [shape: f32[9,6,128], index: 1, kind: output, shape index: {}]  }
   0x1   :  { %7 = vsyncpa [#allocation4], 0  ;;  %s348_s6 = smov [#allocation2]  }
   0x2   :  { %s14_s7 = sshll.u32 %s348_s6, 4  ;;  %s15_s7 = int_to_ptr.vmem [resolvable:$true] %s14_s7 }
   0x3   :  { %s312_s8 = scalar_lea.vmem %s15_s7, 128  ;;  %p317_p1 = scmp.lt.s32.totalorder %s15_s7, %s15_s7 }
   0x4   :  { %p313_p0 = scmp.ne.s32.totalorder %s15_s7, %s312_s8  ;;  %p318_p2 = scmp.lt.s32.totalorder %s312_s8, %s312_s8 }
   0x6   :  { %p319_p3 = por %p318_p2, %p317_p1 }
   0x8   :  { %p320_p4 = pnand %p319_p3, %p313_p0 }
   0xa   :  { %323 = shalt.err (!%p320_p4)
}
   0xb   :  { %17 = dma.hbm_to_vmem [thread:$0]  %s396_s0, 128, %s15_s7, [#allocation3]  }
   0xc   :  { %344 = dma.done.wait [#allocation3], 128  }
   0xd   :  { %345 = vsyncadd [#allocation3], 4294967168  ;;  %v371_v0 = vld [vmem:[#allocation2] sm:$0x3f]  ;;  %v349_v12 = vmov 683565275  }
   0xe   :  { %22 = vst [vmem:[#allocation5] sm:$0x3f] %v371_v0  ;;  %v26_v1 = vand.u32 2139095040, %v371_v0  ;;  %v23_v3 = vand.u32 2147483647, %v371_v0  ;;  %vm25_vm7 = vcmp.lt.s32.totalorder %v371_v0, 0  ;;  %vm115_vm15 = vweird.f32 %v371_v0 }
   0xf   :  { %v350_v14 = vmov 2475754826   ;;  %v351_v16 = vmov 2131351028   ;;  %v352_v18 = vmov 2102212464  }
  0x10   :  { %v27_v2 = vshrl.u32 %v26_v1, 23  ;;  %v30_v6 = vand.u32 8388607, %v23_v3  ;;  %v353_v20 = vmov 920167782   ;;  %s355_s0 = smov [#allocation5]  }
  0x11   :  { %v354_v27 = vmov 1326507024   ;;  %vm24_vm8 = vcmp.le.f32.partialorder %v23_v3, 0.7853982  ;;  %s266_s11 = sshll.u32 %s355_s0, 4  ;;  %s267_s11 = int_to_ptr.vmem [resolvable:$true] %s266_s11 }
  0x12   :  { %v278_v4 = vadd.s32 4294967169, %v27_v2  ;;  %v31_v10 = vor.u32 8388608, %v30_v6  ;;  %s324_s12 = scalar_lea.vmem %s267_s11, 1152  ;;  %p329_p6 = scmp.lt.s32.totalorder %s267_s11, %s267_s11 }
  0x13   :  { %p325_p5 = scmp.ne.s32.totalorder %s267_s11, %s324_s12  ;;  %p330_p7 = scmp.lt.s32.totalorder %s324_s12, %s324_s12 }
  0x14   :  { %v33_v5 = vadd.s32 1, %v278_v4  ;;  %v71_v29 = vshll.u32 %v31_v10, 8 }
  0x15   :  { %p331_p8 = por %p330_p7, %p329_p6 }
  0x16   :  { %vm34_vm0 = vcmp.gt.s32.totalorder %v33_v5, 0 }
  0x17   :  { %v35_v7 = vsel %vm34_vm0, %v33_v5, 0  ;;  %p332_p9 = pnand %p331_p8, %p325_p5 }
  0x18   :  { %v37_v8 = vand.u32 31, %v35_v7  ;;  %v36_v9 = vshrl.u32 %v35_v7, 5 }
  0x1a   :  { %v38_v11 = vsub.s32 32, %v37_v8  ;;  %v40_v13 = vshll.u32 %v349_v12, %v37_v8  ;;  %v43_v15 = vshll.u32 %v350_v14, %v37_v8  ;;  %v46_v17 = vshll.u32 %v351_v16, %v37_v8 }
  0x1b   :  { %v49_v19 = vshll.u32 %v352_v18, %v37_v8  ;;  %v52_v21 = vshll.u32 %v353_v20, %v37_v8  ;;  %vm55_vm1 = vcmp.lt.s32.totalorder %v36_v9, 1  ;;  %vm58_vm2 = vcmp.lt.s32.totalorder %v36_v9, 4 }
  0x1c   :  { %v39_v22 = vshrl.u32 %v349_v12, %v38_v11  ;;  %v41_v23 = vshrl.u32 %v350_v14, %v38_v11  ;;  %v44_v24 = vshrl.u32 %v351_v16, %v38_v11  ;;  %v47_v25 = vshrl.u32 %v352_v18, %v38_v11 }
  0x1d   :  { %v50_v26 = vshrl.u32 %v353_v20, %v38_v11  ;;  %v53_v28 = vshrl.u32 %v354_v27, %v38_v11  ;;  %vm56_vm3 = vcmp.lt.s32.totalorder %v36_v9, 2  ;;  %vm57_vm4 = vcmp.lt.s32.totalorder %v36_v9, 3 }
  0x1e   :  { %v42_v30 = vor.u32 %v41_v23, %v40_v13  ;;  %v45_v31 = vor.u32 %v44_v24, %v43_v15  ;;  %v48_v32 = vor.u32 %v47_v25, %v46_v17 }
  0x1f   :  { %v51_v33 = vor.u32 %v50_v26, %v49_v19  ;;  %v54_v34 = vor.u32 %v53_v28, %v52_v21 }
  0x20   :  { %v59_v35 = vsel %vm55_vm1, %v39_v22, %v42_v30  ;;  %v60_v36 = vsel %vm58_vm2, %v48_v32, 2102212464  ;;  %v63_v37 = vsel %vm55_vm1, %v42_v30, %v45_v31  ;;  %v67_v38 = vsel %vm55_vm1, %v45_v31, %v48_v32 }
  0x21   :  { %v61_v39 = vsel %vm57_vm4, %v45_v31, %v60_v36  ;;  %v64_v40 = vsel %vm58_vm2, %v51_v33, 920167782  ;;  %v68_v41 = vsel %vm58_vm2, %v54_v34, 1326507024 }
  0x22   :  { %v65_v42 = vsel %vm57_vm4, %v48_v32, %v64_v40  ;;  %v69_v43 = vsel %vm57_vm4, %v51_v33, %v68_v41  ;;  %v62_v44 = vsel %vm56_vm3, %v59_v35, %v61_v39 }
  0x23   :  { %v66_v45 = vsel %vm56_vm3, %v63_v37, %v65_v42  ;;  %v70_v46 = vsel %vm56_vm3, %v67_v38, %v69_v43  ;;  %v78_v51 = vmul.u32 %v71_v29, %v62_v44 }
  0x24   :  { %v378_v47 = vmul.u32.u64.low %v71_v29, %v70_v46  ;;  %v379_v48 = vmul.u32.u64.high %v71_v29, %v70_v46, %v378_v47  ;;  %v381_v49 = vmul.u32.u64.low %v71_v29, %v66_v45  ;;  %v382_v50 = vmul.u32.u64.high %v71_v29, %v66_v45, %v381_v49 }
  0x26   :  { %vm80_vm5 = vc.u32 %v379_v48, %v381_v49  ;;  %v81_v52 = vadd.s32 1, %v382_v50  ;;  %v79_v63 = vadd.s32 %v381_v49, %v379_v48 }
  0x28   :  { %v82_v53 = vsel %vm80_vm5, %v81_v52, %v382_v50 }
  0x29   :  { %v83_v54 = vadd.s32 %v82_v53, %v78_v51 }
  0x2b   :  { %v84_v55 = vadd.s32 536870912, %v83_v54 }
  0x2d   :  { %v85_v56 = vshrl.u32 %v84_v55, 30 }
  0x2f   :  { %v86_v57 = vshll.u32 %v85_v56, 30  ;;  %v109_v14 = vsub.s32 4, %v85_v56 }
  0x31   :  { %v87_v58 = vsub.s32 %v83_v54, %v86_v57  ;;  %v110_v17 = vsel %vm25_vm7, %v109_v14, %v85_v56 }
  0x32   :  { %v112_v19 = vsel %vm24_vm8, 0, %v110_v17 }
  0x33   :  { %v89_v59 = vsub.s32 0, %v87_v58  ;;  %v116_v20 = vadd.s32 3, %v112_v19  ;;  %v220_v22 = vand.u32 3, %v112_v19 }
  0x35   :  { %v279_v60 = vmin.u32 %v89_v59, %v87_v58  ;;  %v117_v21 = vand.u32 3, %v116_v20  ;;  %vm225_vm10 = vcmp.eq.s32.totalorder %v220_v22, 2  ;;  %vm222_vm12 = vcmp.eq.s32.totalorder %v220_v22, 0 }
  0x36   :  { %vm221_vm14 = vcmp.lt.s32.totalorder %v220_v22, 2 }
  0x37   :  { %v91_v61 = vclz %v279_v60  ;;  %vm122_vm9 = vcmp.eq.s32.totalorder %v117_v21, 2  ;;  %vm119_vm11 = vcmp.eq.s32.totalorder %v117_v21, 0  ;;  %vm118_vm13 = vcmp.lt.s32.totalorder %v117_v21, 2 }
  0x39   :  { %v280_v62 = vadd.s32 4294967294, %v91_v61 }
  0x3b   :  { %vm281_vm6 = vcmp.lt.s32.totalorder %v280_v62, 0 }
  0x3c   :  { %v94_v1 = vsel %vm281_vm6, 0, %v280_v62 }
  0x3d   :  { %v95_v2 = vsub.s32 32, %v94_v1  ;;  %v96_v4 = vshll.u32 %v87_v58, %v94_v1  ;;  %v99_v5 = vsub.s32 4294967266, %v94_v1 }
  0x3f   :  { %v97_v6 = vshrl.u32 %v79_v63, %v95_v2  ;;  %v100_v7 = vadd.s32 127, %v99_v5 }
  0x41   :  { %v98_v8 = vor.u32 %v97_v6, %v96_v4  ;;  %v101_v9 = vshll.u32 %v100_v7, 23 }
  0x43   :  { %v102_v10 = vor.u32 4788187, %v101_v9  ;;  %v105_v11 = vcvt.s32.f32 %v98_v8 }
  0x45   :  { %v103_v12 = vand.u32 2147483647, %v102_v10 }
  0x47   :  { %v106_v13 = vmul.f32 %v105_v11, %v103_v12 }
  0x49   :  { %v107_v15 = vxor.u32 2147483648, %v106_v13 }
  0x4b   :  { %v108_v16 = vsel %vm25_vm7, %v107_v15, %v106_v13 }
  0x4c   :  { %v111_v18 = vsel %vm24_vm8, %v371_v0, %v108_v16 }
  0x4d   :  { %300 = vcosq.f32 %v111_v18 }
  0x4e   :  { %302 = vsinq.f32 %v111_v18 }
  0x5a   :  { %v301_v23 = vpop.eup %300 }
  0x5b   :  { %v303_v24 = vpop.eup %302  ;;  %v123_v25 = vxor.u32 2147483648, %v301_v23 }
  0x5c   :  { %v120_v3 = vxor.u32 2147483648, %v303_v24 }
  0x5d   :  { %v124_v26 = vsel %vm122_vm9, %v123_v25, %v303_v24  ;;  %v227_v27 = vsel %vm225_vm10, %v123_v25, %v303_v24 }
  0x5e   :  { %v121_v28 = vsel %vm119_vm11, %v301_v23, %v120_v3  ;;  %v224_v29 = vsel %vm222_vm12, %v301_v23, %v120_v3 }
  0x5f   :  { %v125_v30 = vsel %vm118_vm13, %v121_v28, %v124_v26  ;;  %v228_v31 = vsel %vm221_vm14, %v224_v29, %v227_v27 }
  0x60   :  { %v126_v32 = vsel %vm115_vm15, nan, %v125_v30  ;;  %v229_v33 = vsel %vm115_vm15, nan, %v228_v31 }
  0x61   :  { %231 = vst [vmem:[#allocation5 + $0x8] sm:$0x3f] %v126_v32  ;;  %233 = vst [vmem:[#allocation5 + $0x28] sm:$0x3f] %v229_v33  ;;  %v234_v34 = vmul.f32 2.0, %v126_v32  ;;  %v236_v35 = vmul.f32 %v126_v32, %v126_v32 }
  0x63   :  { %v235_v36 = vmul.f32 %v234_v34, %v229_v33  ;;  %v237_v37 = vmul.f32 2.0, %v236_v35 }
  0x65   :  { %240 = vst [vmem:[#allocation5 + $0x10] sm:$0x3f] %v235_v36  ;;  %v238_v38 = vsub.f32 1.0, %v237_v37  ;;  %v243_v39 = vmul.f32 2.0, %v235_v36  ;;  %v245_v40 = vmul.f32 %v235_v36, %v235_v36 }
  0x67   :  { %242 = vst [vmem:[#allocation5 + $0x30] sm:$0x3f] %v238_v38  ;;  %v244_v0 = vmul.f32 %v243_v39, %v238_v38  ;;  %v246_v41 = vmul.f32 2.0, %v245_v40 }
  0x69   :  { %249 = vst [vmem:[#allocation5 + $0x18] sm:$0x3f] %v244_v0  ;;  %v247_v42 = vsub.f32 1.0, %v246_v41  ;;  %v252_v43 = vmul.f32 2.0, %v244_v0  ;;  %v254_v44 = vmul.f32 %v244_v0, %v244_v0 }
  0x6b   :  { %251 = vst [vmem:[#allocation5 + $0x38] sm:$0x3f] %v247_v42  ;;  %v253_v45 = vmul.f32 %v252_v43, %v247_v42  ;;  %v255_v46 = vmul.f32 2.0, %v254_v44 }
  0x6d   :  { %258 = vst [vmem:[#allocation5 + $0x20] sm:$0x3f] %v253_v45  ;;  %v256_v47 = vsub.f32 1.0, %v255_v46 }
  0x6f   :  { %260 = vst [vmem:[#allocation5 + $0x40] sm:$0x3f] %v256_v47 }
  0x70   :  { %335 = shalt.err (!%p332_p9)
}
  0x71   :  { %s356_s13 = smov 128   ;;  %s357_s14 = smov 8  }
  0x72   :  { %272 = dma.vmem_to_hbm [thread:$0]  %s267_s11, 1152, %s397_s1, [#allocation4], %s356_s13, %s356_s13, %s357_s14  }
  0x73   :  { %346 = dma.done.wait [#allocation4], 1152  }
  0x74   :  { %347 = vsyncadd [#allocation4], 4294966144 }
  0x75   :  { %276 = vsyncpa [#allocation3], 1 }
  0x76   :  { %277 = vsyncpa [#allocation4], 1 }

</bundles_post_ra>
